<compile_context>
chip_gen: v5e
topology: v5e:2x2
jax: 0.10.0
libtpu: 0.0.40
codegen_flags: <defaults>
</compile_context>

<pallas_src>
import functools

import jax
import jax.numpy as jnp
from jax import lax
from jax.experimental import pallas as pl
from jax.experimental.pallas import tpu as pltpu

_NEG = -1e30                      # "minus infinity" that stays NaN-free
_VMEM_LIMIT = 32 * 1024 * 1024    # safe on v5e/v6e (128 MiB) and v7x (64 MiB)


def _round_up(v, m):
    return (v + m - 1) // m * m


def _w_inv_colnorm_kernel(w_ref, invw_ref):
    """inv_w[0, c] = rsqrt(max(sum_d W[d, c]^2, 1e-24)) == 1/clamp(||W[:,c]||, 1e-12)."""
    w = w_ref[...].astype(jnp.float32)
    invw_ref[...] = lax.rsqrt(
        jnp.maximum(jnp.sum(w * w, axis=0, keepdims=True), 1e-24))


def _am_softmax_kernel(x_ref, w_ref, invw_ref, label_ref,
                       logits_ref, rowloss_ref,
                       m_ref, l_ref, tgt_ref, *,
                       margin, scale, n_rows, n_cols, mxu_dtype):
    bi = pl.program_id(0)
    ci = pl.program_id(1)

    @pl.when(ci == 0)
    def _init():
        m_ref[...] = jnp.full_like(m_ref, _NEG)
        l_ref[...] = jnp.zeros_like(l_ref)
        tgt_ref[...] = jnp.zeros_like(tgt_ref)

    x = x_ref[...].astype(jnp.float32)        # [TB, D]
    inv_w = invw_ref[...]                     # [1, TC] (precomputed per C tile)
    lbl = label_ref[...]                      # [TB, 1] int32

    # Per-row inverse norms: one rsqrt (EUP) on the clamped sum of squares;
    # cost is O(TB*D), negligible vs. the matmul.
    inv_x = lax.rsqrt(jnp.maximum(jnp.sum(x * x, axis=1, keepdims=True), 1e-24))

    # Raw matmul on the MXU (bf16 feed, f32 accumulate); normalize the output.
    raw = jnp.dot(x.astype(mxu_dtype), w_ref[...].astype(mxu_dtype),
                  preferred_element_type=jnp.float32)            # [TB, TC]
    costh = raw * inv_x * inv_w

    tb, tc = costh.shape
    cols = ci * tc + lax.broadcasted_iota(jnp.int32, (tb, tc), 1)  # global class id
    onehot = (cols == lbl).astype(jnp.float32)
    logits = (costh - margin * onehot) * scale
    logits_ref[...] = logits                                       # lane-dense store

    # Online logsumexp across C tiles; padded class columns masked out.
    masked = jnp.where(cols < n_cols, logits, _NEG)
    m_new = jnp.maximum(m_ref[...], jnp.max(masked, axis=-1, keepdims=True))
    alpha = jnp.exp(m_ref[...] - m_new)
    l_ref[...] = alpha * l_ref[...] + jnp.sum(jnp.exp(masked - m_new),
                                              axis=-1, keepdims=True)
    m_ref[...] = m_new
    tgt_ref[...] = tgt_ref[...] + jnp.sum(logits * onehot, axis=-1, keepdims=True)

    @pl.when(ci == pl.num_programs(1) - 1)
    def _finalize():
        lse = m_ref[...] + jnp.log(l_ref[...])
        per_row = lse - tgt_ref[...]
        rows = bi * tb + lax.broadcasted_iota(jnp.int32, (tb, 1), 0)
        rowloss_ref[...] = jnp.where(rows < n_rows, per_row, 0.0)   # mask padded rows


def am_softmax(x, W, label, *, margin=0.2, scale=30.0,
               mxu_dtype=jnp.bfloat16, tile_b=None, tile_c=None):
    """Returns (loss, costh_m_s) matching the PyTorch module's forward."""
    B, D = x.shape
    D2, C = W.shape
    assert D == D2 and label.shape[0] == B

    # Tile sizes: lane-dense C tiles (multiple of 128; >=256 fills v6e/v7x's
    # 256-wide MXU), 8-sublane-aligned B tiles.
    if tile_c is None:
        tile_c = 256 if C >= 256 else 128
    if tile_b is None:
        tile_b = min(_round_up(B, 8), 128)
    assert tile_c % 128 == 0 and tile_b % 8 == 0

    B_pad = _round_up(B, tile_b)
    C_pad = _round_up(C, tile_c)
    # NOTE: for real models D should also be a multiple of 128 to avoid padded
    # MXU layouts on the K dimension; small D is accepted as-is here.

    xp = x.astype(jnp.float32)
    if B_pad != B:
        xp = jnp.pad(xp, ((0, B_pad - B), (0, 0)))
    wp = W.astype(jnp.float32)
    if C_pad != C:
        wp = jnp.pad(wp, ((0, 0), (0, C_pad - C)))
    lbl = label.reshape(B, 1).astype(jnp.int32)
    if B_pad != B:
        lbl = jnp.pad(lbl, ((0, B_pad - B), (0, 0)))

    n_b, n_c = B_pad // tile_b, C_pad // tile_c

    # Preamble: per-class inverse column norms of W, computed once (not once
    # per B tile inside the hot loop).
    inv_w = pl.pallas_call(
        _w_inv_colnorm_kernel,
        out_shape=jax.ShapeDtypeStruct((1, C_pad), jnp.float32),
        grid_spec=pltpu.PrefetchScalarGridSpec(
            num_scalar_prefetch=0,
            grid=(n_c,),
            in_specs=[pl.BlockSpec((D, tile_c), lambda ci: (0, ci))],
            out_specs=pl.BlockSpec((1, tile_c), lambda ci: (0, ci)),
        ),
        compiler_params=pltpu.CompilerParams(
            dimension_semantics=("parallel",),
            vmem_limit_bytes=_VMEM_LIMIT),
    )(wp)

    kernel = functools.partial(
        _am_softmax_kernel, margin=float(margin), scale=float(scale),
        n_rows=B, n_cols=C, mxu_dtype=mxu_dtype)

    logits_pad, row_loss = pl.pallas_call(
        kernel,
        out_shape=(jax.ShapeDtypeStruct((B_pad, C_pad), jnp.float32),  # costh_m_s
                   jax.ShapeDtypeStruct((B_pad, 1), jnp.float32)),     # per-row CE
        grid_spec=pltpu.PrefetchScalarGridSpec(
            num_scalar_prefetch=0,
            grid=(n_b, n_c),                        # B parallel, C reduction (last)
            in_specs=[
                pl.BlockSpec((tile_b, D), lambda bi, ci: (bi, 0)),       # x
                pl.BlockSpec((D, tile_c), lambda bi, ci: (0, ci)),       # W (raw)
                pl.BlockSpec((1, tile_c), lambda bi, ci: (0, ci)),       # inv_w
                pl.BlockSpec((tile_b, 1), lambda bi, ci: (bi, 0)),       # label
            ],
            out_specs=(
                pl.BlockSpec((tile_b, tile_c), lambda bi, ci: (bi, ci)), # logits
                pl.BlockSpec((tile_b, 1), lambda bi, ci: (bi, 0)),       # row loss
            ),
            scratch_shapes=[pltpu.VMEM((tile_b, 1), jnp.float32)] * 3,   # m, l, tgt
        ),
        compiler_params=pltpu.CompilerParams(
            dimension_semantics=("parallel", "arbitrary"),
            vmem_limit_bytes=_VMEM_LIMIT),
    )(xp, wp, inv_w, lbl)

    loss = jnp.sum(row_loss) / B        # mean over the real batch
    return loss, logits_pad[:B, :C]


if __name__ == "__main__":
    # Small shapes, but chosen so the grid is real: 3 B tiles x 2 C tiles,
    # with C padded 200 -> 256 (lane-dense output + padded-column masking).
    B, nOut, nClasses = 24, 32, 200
    margin, scale = 0.2, 30.0

    key = jax.random.PRNGKey(0)
    kx, kw, kl = jax.random.split(key, 3)
    x = jax.random.normal(kx, (B, nOut), dtype=jnp.float32)
    std = (2.0 / (nOut + nClasses)) ** 0.5          # xavier_normal_, gain=1
    W = std * jax.random.normal(kw, (nOut, nClasses), dtype=jnp.float32)
    label = jax.random.randint(kl, (B,), 0, nClasses, dtype=jnp.int32)

    loss, costh_m_s = am_softmax(x, W, label, margin=margin, scale=scale,
                                 tile_b=8, tile_c=128)
    jax.block_until_ready((loss, costh_m_s))
    assert costh_m_s.shape == (B, nClasses)

    onehot = jax.nn.one_hot(label, nClasses, dtype=jnp.float32)
    inv_x = lax.rsqrt(jnp.maximum(jnp.sum(x * x, axis=1, keepdims=True), 1e-24))
    inv_w = lax.rsqrt(jnp.maximum(jnp.sum(W * W, axis=0, keepdims=True), 1e-24))

    def ce_mean(lg):
        m = jnp.max(lg, axis=-1, keepdims=True)
        lse = (m + jnp.log(jnp.sum(jnp.exp(lg - m), axis=-1, keepdims=True)))[:, 0]
        tgt = jnp.sum(lg * onehot, axis=-1)
        return jnp.mean(lse - tgt)

    # (1) Tight check vs. a pure-JAX reference of the SAME algorithm
    #     (bf16 MXU feed, f32 accumulate, post-matmul normalization).
    raw = jnp.dot(x.astype(jnp.bfloat16), W.astype(jnp.bfloat16),
                  preferred_element_type=jnp.float32)
    logits_alg = scale * (raw * inv_x * inv_w - margin * onehot)
    assert jnp.allclose(costh_m_s, logits_alg, atol=5e-3, rtol=1e-3)
    assert jnp.allclose(loss, ce_mean(logits_alg), atol=5e-3, rtol=1e-3)

    # (2) Semantics check vs. the exact f32 module math; tolerance reflects the
    #     bf16 MXU-feed precision (scale=30 amplifies absolute error).
    costh_f32 = jnp.dot(x * inv_x, W * inv_w,
                        precision=lax.Precision.HIGHEST,
                        preferred_element_type=jnp.float32)
    logits_f32 = scale * (costh_f32 - margin * onehot)
    assert jnp.allclose(costh_m_s, logits_f32, atol=0.25, rtol=0.0)
    assert jnp.allclose(loss, ce_mean(logits_f32), atol=0.1, rtol=0.0)

    print("KERNEL_OK")
</pallas_src>

<mosaic_0001>
module attributes {stable_mosaic.version = 11 : i64} {
  func.func @_w_inv_colnorm_kernel(%arg0: i32, %arg1: memref<32x128xf32, #tpu.memory_space<vmem>>, %arg2: memref<1x128xf32, #tpu.memory_space<vmem>>) attributes {dimension_semantics = [#tpu.dimension_semantics<parallel>], iteration_bounds = array<i64: 2>, scalar_prefetch = 0 : i64, scratch_operands = 0 : i64, tpu.core_type = #tpu.core_type<tc>, window_params = [{transform_indices = @transform_0, window_bounds = array<i64: 32, 128>}, {transform_indices = @transform_1, window_bounds = array<i64: 1, 128>}]} {
    %c0 = arith.constant 0 : index
    %c0_0 = arith.constant 0 : index
    %0 = vector.load %arg1[%c0, %c0_0] : memref<32x128xf32, #tpu.memory_space<vmem>>, vector<32x128xf32>
    %1 = arith.mulf %0, %0 : vector<32x128xf32>
    %cst = arith.constant dense<0.000000e+00> : vector<128xf32>
    %2 = vector.multi_reduction <add>, %1, %cst [0] : vector<32x128xf32> to vector<128xf32>
    %3 = vector.shape_cast %2 : vector<128xf32> to vector<1x128xf32>
    %cst_1 = arith.constant 1.000000e-24 : f32
    %4 = vector.broadcast %cst_1 : f32 to vector<1x128xf32>
    %5 = arith.maximumf %3, %4 : vector<1x128xf32>
    %6 = math.rsqrt %5 : vector<1x128xf32>
    %c0_2 = arith.constant 0 : index
    %c0_3 = arith.constant 0 : index
    %7 = vector.load %arg2[%c0_2, %c0_3] : memref<1x128xf32, #tpu.memory_space<vmem>>, vector<1x128xf32>
    tpu.vector_store %arg2[%c0_2, %c0_3], %6 {strides = array<i32>} : memref<1x128xf32, #tpu.memory_space<vmem>>, vector<1x128xf32>,
    return
  }
  func.func @transform_0(%arg0: i32) -> (i32, i32) {
    %c0_i32 = arith.constant 0 : i32
    %c0_i32_0 = arith.constant 0 : i32
    return %c0_i32, %arg0 : i32, i32
  }
  func.func @transform_1(%arg0: i32) -> (i32, i32) {
    %c0_i32 = arith.constant 0 : i32
    %c0_i32_0 = arith.constant 0 : i32
    return %c0_i32, %arg0 : i32, i32
  }
}

</mosaic_0001>

<bundles_post_ra>
// kernel: tpu_custom_call.1
= control target key start
LH: loop header
LB: loop body
LE: loop exit
PB: predicated region body
PF: predicated region fallthrough
CT: control target
= control target key end

     0   :  { %6 = vsyncpa [#allocation3], 0  ;;  %s540_s0 = inlined_call_operand.hbm [shape: f32[32,256], index: 0, kind: input, shape index: {}]   ;;  %s541_s1 = inlined_call_operand.hbm [shape: f32[1,256], index: 1, kind: output, shape index: {}]  }
   0x1   :  { %8 = vsyncpa [#allocation3 + $0x1], 0 }
   0x2   :  { %9 = vsyncpa [#allocation4], 0 }
   0x3   :  { %11 = vsyncpa [#allocation4 + $0x1], 0  ;;  %s414_s6 = smov 0   ;;  %s416_s7 = smov 0  }
   0x4   :  { %s418_s8 = smov 0   ;;  %s420_s9 = smov 0  }
   0x5 LB: > { %s435_s10 = sadd.s32 4294967295, %s399_s9   ;;  %s243_s11 = sadd.s32 4294967294, %s399_s9   ;;  %s399_s9 = sphi %s420_s9, %s550_s9   ;;  %s395_s8 = sphi %s418_s8, %s549_s8   ;;  %s391_s7 = sphi %s416_s7, %s548_s7   ;;  %s387_s6 = sphi %s414_s6, %s547_s6  }
   0x6   : > { %s439_s12 = sadd.s32 1, %s399_s9   ;;  %s24_s13 = sadd.s32 1, %s395_s8 }
   0x7   : > { %s21_s14 = ssub.s32 %s399_s9, %s439_s12  ;;  %p31_p0 = scmp.ne.s32.totalorder %s395_s8, %s391_s7 }
   0x8   : > { %p22_p1 = scmp.eq.s32.totalorder %s21_s14, 0  ;;  %p32_p2 = scmp.eq.s32.totalorder %s399_s9, 0 }
   0x9   : > { %p37_p3 = scmp.ne.s32.totalorder %s391_s7, %s387_s6  ;;  %p38_p4 = scmp.eq.s32.totalorder %s435_s10, 0 }
   0xa   : > { %s451_s15 = scalar_select %p22_p1, %s395_s8, %s24_s13  }
   0xb   : > { %p453_p5 = por %p32_p2, %p31_p0  ;;  %p457_p6 = por %p38_p4, %p37_p3 }
   0xc   : > { %p61_p7 = scmp.eq.s32.totalorder %s435_s10, 1  ;;  %p67_p8 = scmp.eq.s32.totalorder %s243_s11, 1 }
   0xd   : > { %p245_p9 = scmp.ge.s32.totalorder %s399_s9, 2  ;;  %p264_p10 = scmp.lt.s32.totalorder %s399_s9, 2 }
   0xe   : > { %p464_p11 = por %p61_p7, %p31_p0  ;;  %p468_p12 = por %p67_p8, %p37_p3 }
   0xf   : > { %s87_s20 = sand.u32 1, %s395_s8   ;;  %s247_s21 = sshll.u32 %s399_s9, 3 }
  0x10   : > { %s246_s22 = sshll.u32 %s87_s20, 5  ;;  %s95_s25 = scalar_lea.hbm %s540_s0, %s247_s21 }
  0x11   : > { %s96_s26 = sshll.u32 %s95_s25, 4  ;;  %s91_s27 = scalar_lea.vmem [#allocation2], %s246_s22  ;;  %s97_s26 = int_to_ptr.hbm [resolvable:$true] %s96_s26 }
  0x12   : > { %s98_s28 = sshll.u32 %s91_s27, 4  ;;  %p479_p13 = pnand %p264_p10, %p453_p5  ;;  %s99_s28 = int_to_ptr.vmem [resolvable:$true] %s98_s28 }
  0x13   : > { %p248_p0 = scmp.ge.s32.totalorder %s399_s9, 1  ;;  %s88_s30 = scalar_lea.sflag [#allocation3], %s87_s20 }
  0x14   : > { %s303_s2 = sshra.s32 %s97_s26, 4  ;;  %p307_p2 = pneg %p479_p13  ;;  %s304_s2 = int_to_ptr.hbm [resolvable:$true] %s303_s2 }
  0x15   : > { %s305_s3 = scalar_lea.hbm %s304_s2, 32  ;;  %s310_s11 = scalar_lea.hbm %s540_s0, 64 }
  0x16   : > { %p306_p1 = scmp.ne.s32.totalorder %s304_s2, %s305_s3  ;;  %p311_p5 = scmp.lt.s32.totalorder %s304_s2, %s540_s0 }
  0x17   : > { %p312_p7 = scmp.lt.s32.totalorder %s310_s11, %s305_s3 }
  0x18   : > { %p308_p3 = pnand %p307_p2, %p306_p1 }
  0x19   : > { %p313_p8 = por %p312_p7, %p311_p5 }
  0x1a   : > { %p309_p4 = pneg %p308_p3 }
  0x1c   : > { %p314_p10 = pnand %p313_p8, %p309_p4 }
  0x1e   : > { %317 = shalt.err (!%p314_p10)
}
  0x1f   : > { %s401_s16 = smov 256   ;;  %s402_s20 = smov 128  }
  0x20   : > { %s403_s21 = smov 8   ;;  %p106_p1 = scmp.lt.s32.totalorder %s399_s9, 3 }
  0x21   : > { %259 = dma.hbm_to_vmem [thread:$0]  (!%p479_p13), %s97_s26, 512, %s99_s28, %s88_s30, %s401_s16, %s402_s20, %s403_s21  }
  0x22   : > { %p107_p2 = pnand %p248_p0, %p106_p1 }
  0x23   : > { %s498_s22 = sand.u32 (!%p107_p2), 1, %s391_s7  }
  0x24   : > { %110 = sbr.rel (%p107_p2) target bundleno = 86 (0x56), region = 24  ;;  %s249_s23 = sshll.u32 (!%p107_p2), %s498_s22, 5 }
  0x25   : > { %s113_s24 = scalar_lea.sflag (!%p107_p2), [#allocation3], %s498_s22  ;;  %s116_s25 = scalar_lea.vmem (!%p107_p2), [#allocation2], %s249_s23 }
  0x29   : > { %378 = dma.done.wait (%p457_p6), %s113_s24, 512  }
  0x2a   : > { %380 = vsyncadd (%p457_p6), %s113_s24, 4294966784  ;;  %v135_v0 = vld [vmem:[%s116_s25] sm:$0xff]  ;;  %v136_v1 = vld [vmem:[%s116_s25 + $0x8] sm:$0xff]  ;;  %s173_s27 = scalar_lea.hbm %s541_s1, %s435_s10  ;;  %s134_s28 = scalar_lea.vmem [#allocation5], %s498_s22 }
  0x2b   : > { %v137_v2 = vld [vmem:[%s116_s25 + $0x10] sm:$0xff]  ;;  %v138_v3 = vld [vmem:[%s116_s25 + $0x18] sm:$0xff]  ;;  %v139_v4 = vmul.f32 %v135_v0, %v135_v0  ;;  %v140_v5 = vmul.f32 %v136_v1, %v136_v1  ;;  %s175_s29 = sshll.u32 %s134_s28, 4  ;;  %s177_s30 = sshll.u32 %s173_s27, 4  ;;  %s176_s29 = int_to_ptr.vmem [resolvable:$true] %s175_s29  ;;  %s178_s30 = int_to_ptr.hbm [resolvable:$true] %s177_s30 }
  0x2c   : > { %v141_v6 = vmul.f32 %v137_v2, %v137_v2  ;;  %v142_v7 = vmul.f32 %v138_v3, %v138_v3  ;;  %s165_s2 = scalar_lea.sflag [#allocation4], %s498_s22  ;;  %s347_s3 = sshra.s32 %s178_s30, 4  ;;  %s348_s3 = int_to_ptr.hbm [resolvable:$true] %s347_s3 }
  0x2d   : > { %v143_v8 = vadd.f32 %v140_v5, %v139_v4  ;;  %s349_s4 = scalar_lea.hbm %s348_s3, 1  ;;  %s353_s11 = scalar_lea.hbm %s541_s1, 2 }
  0x2e   : > { %p350_p6 = scmp.ne.s32.totalorder %s348_s3, %s349_s4  ;;  %p354_p3 = scmp.lt.s32.totalorder %s348_s3, %s541_s1 }
  0x2f   : > { %v144_v9 = vadd.f32 %v143_v8, %v141_v6  ;;  %p355_p4 = scmp.lt.s32.totalorder %s353_s11, %s349_s4 }
  0x30   : > { %p351_p13 = pnand %p350_p6, %p464_p11 }
  0x31   : > { %v145_v10 = vadd.f32 %v144_v9, %v142_v7  ;;  %p356_p5 = por %p355_p4, %p354_p3 }
  0x32   : > { %p352_p0 = pneg %p351_p13 }
  0x33   : > { %v146_v11 = vrot.slane %v145_v10, 4 }
  0x34   : > { %p357_p7 = pnand %p356_p5, %p352_p0 }
  0x35   : > { %v147_v12 = vadd.f32 %v146_v11, %v145_v10 }
  0x37   : > { %v148_v13 = vrot.slane %v147_v12, 2 }
  0x39   : > { %v149_v14 = vadd.f32 %v148_v13, %v147_v12 }
  0x3b   : > { %v150_v15 = vrot.slane %v149_v14, 1 }
  0x3d   : > { %v151_v16 = vadd.f32 %v150_v15, %v149_v14 }
  0x3f   : > { %v152_v17 = vmax.f32 %v151_v16, 1e-24 }
  0x41   : > { %301 = vrsqrt.f32 %v152_v17  ;;  %vm159_vm0 = vweird.f32 %v152_v17 }
  0x47   : > { %v302_v18 = vpop.eup %301 }
  0x48   : > { %v154_v19 = vmul.f32 %v302_v18, %v152_v17  ;;  %vm160_vm1 = vweird.f32 %v302_v18 }
  0x49   : > { %vm161_vm2 = vmor %vm159_vm0, %vm160_vm1 }
  0x4a   : > { %v155_v20 = vmul.f32 %v302_v18, %v154_v19 }
  0x4c   : > { %v156_v21 = vmul.f32 0.5, %v155_v20 }
  0x4e   : > { %v157_v22 = vsub.f32 1.5, %v156_v21 }
  0x50   : > { %v158_v23 = vmul.f32 %v302_v18, %v157_v22 }
  0x52   : > { %v162_v24 = vsel %vm161_vm2, %v302_v18, %v158_v23 }
  0x53   : > { %163 = vst [vmem:[%s134_s28] sm:$0x1] %v162_v24 }
  0x54   : > { %360 = shalt.err (!%p357_p7)
}
  0x55   : > { %254 = dma.vmem_to_hbm [thread:$0]  (%p464_p11), %s176_s29, 16, %s178_s30, %s165_s2  }
  0x56 PF: > { %s189_s16 = sand.u32 1, %s387_s6   ;;  %p261_p8 = pnand %p245_p9, %p468_p12 }
  0x57   : > { %s190_s20 = scalar_lea.sflag [#allocation4], %s189_s16 }
  0x58   : > { %p262_p10 = pneg %p261_p8 }
  0x5a   : > { %382 = dma.done.wait (%p262_p10), %s190_s20, 16  }
  0x5b   : > { %384 = vsyncadd (%p262_p10), %s190_s20, 4294967280  ;;  %p14_p1 = scmp.ge.s32.totalorder %s439_s12, 4   ;;  %s547_s6 = smov %s391_s7 }
  0x5c   : > { %s548_s7 = smov %s395_s8  ;;  %s549_s8 = smov %s451_s15 }
  0x5d   : > { %s550_s9 = smov %s439_s12  ;;  %16 = sbr.rel (!%p14_p1) target bundleno = 5 (0x5), region = 69 }
  0x62   :  { %195 = vsyncpa [#allocation3], 1 }
  0x63   :  { %197 = vsyncpa [#allocation3 + $0x1], 1 }
  0x64   :  { %198 = vsyncpa [#allocation4], 1 }
  0x65   :  { %200 = vsyncpa [#allocation4 + $0x1], 1 }

</bundles_post_ra>
